<compile_context>
chip_gen: v5e
topology: v5e:2x2
jax: 0.10.0
libtpu: 0.0.40
codegen_flags: <defaults>
</compile_context>

<pallas_src>
import jax
import jax.numpy as jnp
from jax.experimental import pallas as pl
from jax.experimental.pallas import tpu as pltpu

IN_DIM = 400
HIDDEN = 32   # num_hidden_nodes
BATCH = 8

LANE = 128
SUBLANE = 8
DEFAULT_BATCH_TILE = 512   # pipeline-efficient on v5e/v6e, fits v7x 64 MiB VMEM easily


def _round_up(x, m):
    return ((x + m - 1) // m) * m


def _sigmoid(x):
    # exp -> EUP slot, approx reciprocal -> EUP slot; VALU only does the add.
    return pl.reciprocal(1.0 + jnp.exp(-x), approx=True)


def autoencoder_kernel(x_ref, w1_ref, b1_ref, w2_ref, b2_ref, out_ref):
    # Encoder: sigmoid(x @ W1 + b1)   (bf16 MXU inputs, f32 accumulate)
    x = x_ref[...]                                                     # [TB, Dp] bf16
    pre1 = jnp.dot(x, w1_ref[...], preferred_element_type=jnp.float32)  # [TB, Hp] f32
    h = _sigmoid(pre1 + b1_ref[...])                                   # f32
    # Decoder: sigmoid(h @ W2 + b2)   (padded hidden cols hit zero W2 rows)
    pre2 = jnp.dot(h.astype(jnp.bfloat16), w2_ref[...],
                   preferred_element_type=jnp.float32)                 # [TB, Dp] f32
    out_ref[...] = _sigmoid(pre2 + b2_ref[...]).astype(out_ref.dtype)


def autoencoder_forward(x, w1, b1, w2, b2, *, batch_tile=DEFAULT_BATCH_TILE):
    """x: [B, D] f32; w1: [D, H]; b1: [1, H]; w2: [H, D]; b2: [1, D]."""
    B, D = x.shape
    H = w1.shape[1]

    # Lane-dense padding: D=400 -> 512, H=32 -> 128. Zero pads keep math exact:
    #  - extra K columns of x / rows of w1 are zero -> no encoder contribution,
    #  - extra hidden units become sigmoid(0)=0.5 but multiply zero w2 rows,
    #  - extra output columns / batch rows are sliced off below.
    Dp = _round_up(D, LANE)
    Hp = _round_up(H, LANE)

    TB = min(batch_tile, _round_up(B, SUBLANE))
    TB = _round_up(TB, SUBLANE)
    Bp = _round_up(B, TB)

    bf16 = jnp.bfloat16
    x_p = jnp.zeros((Bp, Dp), bf16).at[:B, :D].set(x.astype(bf16))
    w1_p = jnp.zeros((Dp, Hp), bf16).at[:D, :H].set(w1.astype(bf16))
    b1_p = jnp.zeros((1, Hp), jnp.float32).at[:, :H].set(b1.astype(jnp.float32))
    w2_p = jnp.zeros((Hp, Dp), bf16).at[:H, :D].set(w2.astype(bf16))
    b2_p = jnp.zeros((1, Dp), jnp.float32).at[:, :D].set(b2.astype(jnp.float32))

    grid = (Bp // TB,)

    out_p = pl.pallas_call(
        autoencoder_kernel,
        out_shape=jax.ShapeDtypeStruct((Bp, Dp), jnp.float32),
        grid_spec=pltpu.PrefetchScalarGridSpec(
            num_scalar_prefetch=0,
            grid=grid,
            in_specs=[
                pl.BlockSpec((TB, Dp), lambda i: (i, 0)),   # x: tiled over batch
                pl.BlockSpec((Dp, Hp), lambda i: (0, 0)),   # W1: resident
                pl.BlockSpec((1, Hp), lambda i: (0, 0)),    # b1: resident
                pl.BlockSpec((Hp, Dp), lambda i: (0, 0)),   # W2: resident
                pl.BlockSpec((1, Dp), lambda i: (0, 0)),    # b2: resident
            ],
            out_specs=pl.BlockSpec((TB, Dp), lambda i: (i, 0)),
        ),
        compiler_params=pltpu.CompilerParams(
            dimension_semantics=("parallel",),      # shards over 2 TCs on v7x
            vmem_limit_bytes=32 * 1024 * 1024,      # far below v7x 64 MiB physical
        ),
    )(x_p, w1_p, b1_p, w2_p, b2_p)

    return out_p[:B, :D]


def init_params(key, in_dim=IN_DIM, hidden=HIDDEN):
    # Deterministic PyTorch-style uniform(-1/sqrt(fan_in), 1/sqrt(fan_in)) init.
    k1, k2, k3, k4 = jax.random.split(key, 4)
    bound1 = 1.0 / jnp.sqrt(in_dim)
    bound2 = 1.0 / jnp.sqrt(hidden)
    w1 = jax.random.uniform(k1, (in_dim, hidden), jnp.float32, -bound1, bound1)
    b1 = jax.random.uniform(k2, (1, hidden), jnp.float32, -bound1, bound1)
    w2 = jax.random.uniform(k3, (hidden, in_dim), jnp.float32, -bound2, bound2)
    b2 = jax.random.uniform(k4, (1, in_dim), jnp.float32, -bound2, bound2)
    return w1, b1, w2, b2


if __name__ == "__main__":
    key = jax.random.PRNGKey(0)
    kx, kp = jax.random.split(key)
    x = jax.random.uniform(kx, (BATCH, IN_DIM), jnp.float32)
    w1, b1, w2, b2 = init_params(kp)

    out = autoencoder_forward(x, w1, b1, w2, b2)
    out = jax.block_until_ready(out)

    # Pure-JAX f32 reference. bf16 MXU inputs + approx reciprocal -> loosened tol.
    h_ref = jax.nn.sigmoid(x @ w1 + b1)
    d_ref = jax.nn.sigmoid(h_ref @ w2 + b2)
    assert out.shape == (BATCH, IN_DIM)
    assert jnp.allclose(out, d_ref, atol=2e-2), "mismatch vs reference"

    print("KERNEL_OK")
</pallas_src>

<mosaic_0001>
module attributes {stable_mosaic.version = 11 : i64} {
  func.func @autoencoder_kernel(%arg0: i32, %arg1: memref<8x512xbf16, #tpu.memory_space<vmem>>, %arg2: memref<512x128xbf16, #tpu.memory_space<vmem>>, %arg3: memref<1x128xf32, #tpu.memory_space<vmem>>, %arg4: memref<128x512xbf16, #tpu.memory_space<vmem>>, %arg5: memref<1x512xf32, #tpu.memory_space<vmem>>, %arg6: memref<8x512xf32, #tpu.memory_space<vmem>>) attributes {dimension_semantics = [#tpu.dimension_semantics<parallel>], iteration_bounds = array<i64: 1>, scalar_prefetch = 0 : i64, scratch_operands = 0 : i64, tpu.core_type = #tpu.core_type<tc>, window_params = [{transform_indices = @transform_0, window_bounds = array<i64: 8, 512>}, {pipeline_mode = #tpu.pipeline_mode<synchronous>, transform_indices = @transform_1, window_bounds = array<i64: 512, 128>}, {pipeline_mode = #tpu.pipeline_mode<synchronous>, transform_indices = @transform_2, window_bounds = array<i64: 1, 128>}, {pipeline_mode = #tpu.pipeline_mode<synchronous>, transform_indices = @transform_3, window_bounds = array<i64: 128, 512>}, {pipeline_mode = #tpu.pipeline_mode<synchronous>, transform_indices = @transform_4, window_bounds = array<i64: 1, 512>}, {transform_indices = @transform_5, window_bounds = array<i64: 8, 512>}]} {
    %c0 = arith.constant 0 : index
    %c0_0 = arith.constant 0 : index
    %0 = vector.load %arg1[%c0, %c0_0] : memref<8x512xbf16, #tpu.memory_space<vmem>>, vector<8x512xbf16>
    %c0_1 = arith.constant 0 : index
    %c0_2 = arith.constant 0 : index
    %1 = vector.load %arg2[%c0_1, %c0_2] : memref<512x128xbf16, #tpu.memory_space<vmem>>, vector<512x128xbf16>
    %cst = arith.constant dense<0.000000e+00> : vector<8x128xf32>
    %2 = tpu.matmul %0, %1, %cst {dimension_numbers = #tpu.dot_dimension_numbers<[1], [0], [0], [1], [0, 0, 1, 1], [], []>} : vector<8x512xbf16>, vector<512x128xbf16>, vector<8x128xf32> -> vector<8x128xf32>
    %c0_3 = arith.constant 0 : index
    %c0_4 = arith.constant 0 : index
    %3 = vector.load %arg3[%c0_3, %c0_4] : memref<1x128xf32, #tpu.memory_space<vmem>>, vector<1x128xf32>
    %4 = vector.broadcast %3 : vector<1x128xf32> to vector<8x128xf32>
    %5 = arith.addf %2, %4 : vector<8x128xf32>
    %cst_5 = arith.constant 0.000000e+00 : f32
    %6 = vector.broadcast %cst_5 : f32 to vector<8x128xf32>
    %7 = arith.subf %6, %5 : vector<8x128xf32>
    %8 = math.exp %7 : vector<8x128xf32>
    %cst_6 = arith.constant 1.000000e+00 : f32
    %9 = vector.broadcast %cst_6 : f32 to vector<8x128xf32>
    %10 = arith.addf %9, %8 : vector<8x128xf32>
    %11 = tpu.reciprocal %10 {approx = true} : vector<8x128xf32> -> vector<8x128xf32>
    %12 = arith.truncf %11 : vector<8x128xf32> to vector<8x128xbf16>
    %c0_7 = arith.constant 0 : index
    %c0_8 = arith.constant 0 : index
    %13 = vector.load %arg4[%c0_7, %c0_8] : memref<128x512xbf16, #tpu.memory_space<vmem>>, vector<128x512xbf16>
    %cst_9 = arith.constant dense<0.000000e+00> : vector<8x512xf32>
    %14 = tpu.matmul %12, %13, %cst_9 {dimension_numbers = #tpu.dot_dimension_numbers<[1], [0], [0], [1], [0, 0, 1, 1], [], []>} : vector<8x128xbf16>, vector<128x512xbf16>, vector<8x512xf32> -> vector<8x512xf32>
    %c0_10 = arith.constant 0 : index
    %c0_11 = arith.constant 0 : index
    %15 = vector.load %arg5[%c0_10, %c0_11] : memref<1x512xf32, #tpu.memory_space<vmem>>, vector<1x512xf32>
    %16 = vector.broadcast %15 : vector<1x512xf32> to vector<8x512xf32>
    %17 = arith.addf %14, %16 : vector<8x512xf32>
    %cst_12 = arith.constant 0.000000e+00 : f32
    %18 = vector.broadcast %cst_12 : f32 to vector<8x512xf32>
    %19 = arith.subf %18, %17 : vector<8x512xf32>
    %20 = math.exp %19 : vector<8x512xf32>
    %cst_13 = arith.constant 1.000000e+00 : f32
    %21 = vector.broadcast %cst_13 : f32 to vector<8x512xf32>
    %22 = arith.addf %21, %20 : vector<8x512xf32>
    %23 = tpu.reciprocal %22 {approx = true} : vector<8x512xf32> -> vector<8x512xf32>
    %c0_14 = arith.constant 0 : index
    %c0_15 = arith.constant 0 : index
    %24 = vector.load %arg6[%c0_14, %c0_15] : memref<8x512xf32, #tpu.memory_space<vmem>>, vector<8x512xf32>
    tpu.vector_store %arg6[%c0_14, %c0_15], %23 {strides = array<i32>} : memref<8x512xf32, #tpu.memory_space<vmem>>, vector<8x512xf32>,
    return
  }
  func.func @transform_0(%arg0: i32) -> (i32, i32) {
    %c0_i32 = arith.constant 0 : i32
    %c0_i32_0 = arith.constant 0 : i32
    return %arg0, %c0_i32 : i32, i32
  }
  func.func @transform_1(%arg0: i32) -> (i32, i32) {
    %c0_i32 = arith.constant 0 : i32
    %c0_i32_0 = arith.constant 0 : i32
    %c0_i32_1 = arith.constant 0 : i32
    return %c0_i32, %c0_i32_0 : i32, i32
  }
  func.func @transform_2(%arg0: i32) -> (i32, i32) {
    %c0_i32 = arith.constant 0 : i32
    %c0_i32_0 = arith.constant 0 : i32
    %c0_i32_1 = arith.constant 0 : i32
    return %c0_i32, %c0_i32_0 : i32, i32
  }
  func.func @transform_3(%arg0: i32) -> (i32, i32) {
    %c0_i32 = arith.constant 0 : i32
    %c0_i32_0 = arith.constant 0 : i32
    %c0_i32_1 = arith.constant 0 : i32
    return %c0_i32, %c0_i32_0 : i32, i32
  }
  func.func @transform_4(%arg0: i32) -> (i32, i32) {
    %c0_i32 = arith.constant 0 : i32
    %c0_i32_0 = arith.constant 0 : i32
    %c0_i32_1 = arith.constant 0 : i32
    return %c0_i32, %c0_i32_0 : i32, i32
  }
  func.func @transform_5(%arg0: i32) -> (i32, i32) {
    %c0_i32 = arith.constant 0 : i32
    %c0_i32_0 = arith.constant 0 : i32
    return %arg0, %c0_i32 : i32, i32
  }
}

</mosaic_0001>

<bundles_post_ra>
// kernel: tpu_custom_call.1
= control target key start
LH: loop header
LB: loop body
LE: loop exit
PB: predicated region body
PF: predicated region fallthrough
CT: control target
= control target key end

     0   :  { %10 = vsyncpa [#allocation3], 0  ;;  %s1246_s0 = inlined_call_operand.hbm [shape: bf16[8,512], index: 0, kind: input, shape index: {}]   ;;  %s1247_s1 = inlined_call_operand.hbm [shape: bf16[512,128], index: 1, kind: input, shape index: {}]   ;;  %s1248_s2 = inlined_call_operand.vmem [shape: f32[1,128], index: 2, kind: input, shape index: {}]   ;;  %s1249_s3 = inlined_call_operand.hbm [shape: bf16[128,512], index: 3, kind: input, shape index: {}]   ;;  %s1250_s4 = inlined_call_operand.hbm [shape: f32[1,512], index: 4, kind: input, shape index: {}]   ;;  %s1251_s5 = inlined_call_operand.hbm [shape: f32[8,512], index: 5, kind: output, shape index: {}]  }
   0x1   :  { %11 = vsyncpa [#allocation6], 0 }
   0x2   :  { %12 = vsyncpa [#allocation9], 0  ;;  %s29_s20 = sshll.u32 %s1247_s1, 4  ;;  %s30_s20 = int_to_ptr.hbm [resolvable:$true] %s29_s20 }
   0x3   :  { %13 = vsyncpa [#allocation4], 0  ;;  %s1189_s21 = smov [#allocation5]   ;;  %s19_s25 = sshll.u32 %s1246_s0, 4  ;;  %s20_s25 = int_to_ptr.hbm [resolvable:$true] %s19_s25 }
   0x4   :  { %s31_s22 = sshll.u32 %s1189_s21, 4  ;;  %s1190_s26 = smov 64   ;;  %s32_s22 = int_to_ptr.vmem [resolvable:$true] %s31_s22 }
   0x5   :  { %s1191_s27 = smov 4   ;;  %s1192_s28 = smov [#allocation2]  }
   0x6   :  { %37 = dma.hbm_to_vmem [thread:$0]  %s30_s20, 4096, %s32_s22, [#allocation6], %s1190_s26, %s1190_s26, %s1191_s27  }
   0x7   :  { %s21_s29 = sshll.u32 %s1192_s28, 4  ;;  %s44_s7 = sshll.u32 %s1249_s3, 4  ;;  %s22_s29 = int_to_ptr.vmem [resolvable:$true] %s21_s29  ;;  %s45_s7 = int_to_ptr.hbm [resolvable:$true] %s44_s7 }
   0x8   :  { %24 = dma.hbm_to_vmem [thread:$0]  %s20_s25, 256, %s22_s29, [#allocation3]  }
   0x9   :  { %s1193_s1 = smov [#allocation7]   ;;  %s58_s0 = sshll.u32 %s1250_s4, 4  ;;  %s59_s0 = int_to_ptr.hbm [resolvable:$true] %s58_s0 }
   0xa   :  { %s46_s8 = sshll.u32 %s1193_s1, 4  ;;  %s1194_s11 = smov 256   ;;  %s47_s8 = int_to_ptr.vmem [resolvable:$true] %s46_s8 }
   0xb   :  { %s1195_s12 = smov 16   ;;  %s1196_s13 = smov [#allocation8]  }
   0xc   :  { %52 = dma.hbm_to_vmem [thread:$0]  %s45_s7, 4096, %s47_s8, [#allocation6], %s1194_s11, %s1194_s11, %s1195_s12  }
   0xd   :  { %s60_s14 = sshll.u32 %s1196_s13, 4  ;;  %s61_s14 = int_to_ptr.vmem [resolvable:$true] %s60_s14 }
   0xe   :  { %63 = dma.hbm_to_vmem [thread:$0]  %s59_s0, 64, %s61_s14, [#allocation9]  }
   0xf   :  { %1181 = dma.done.wait [#allocation3], 256  }
  0x10   :  { %1182 = vsyncadd [#allocation3], 4294967040 }
  0x11   :  { %1183 = dma.done.wait [#allocation6], 8192  }
  0x12   :  { %1184 = vsyncadd [#allocation6], 4294959104 }
  0x13   :  { %1185 = dma.done.wait [#allocation9], 64  }
  0x14   :  { %1186 = vsyncadd [#allocation9], 4294967232  ;;  %v974_v0 = vld [vmem:[#allocation5 + $0x38] sm:$0xff]  ;;  %v973_v4 = vld [vmem:[#allocation5 + $0x30] sm:$0xff]  ;;  %s699_s18 = sshll.u32 %s1251_s5, 4  ;;  %s700_s18 = int_to_ptr.hbm [resolvable:$true] %s699_s18 }
  0x15   :  { %v982_v1 = vld [vmem:[#allocation5 + $0x78] sm:$0xff]  ;;  %356 = vmatpush.bf16.msra.mxu0 %v974_v0  ;;  %v981_v5 = vld [vmem:[#allocation5 + $0x70] sm:$0xff]  ;;  %v972_v8 = vld [vmem:[#allocation5 + $0x28] sm:$0xff] }
  0x16   :  { %v990_v2 = vld [vmem:[#allocation5 + $0xb8] sm:$0xff]  ;;  %369 = vmatpush.bf16.msra.mxu1 %v982_v1  ;;  %v989_v6 = vld [vmem:[#allocation5 + $0xb0] sm:$0xff]  ;;  %v980_v9 = vld [vmem:[#allocation5 + $0x68] sm:$0xff] }
  0x17   :  { %v998_v3 = vld [vmem:[#allocation5 + $0xf8] sm:$0xff]  ;;  %382 = vmatpush.bf16.msra.mxu2 %v990_v2  ;;  %v997_v7 = vld [vmem:[#allocation5 + $0xf0] sm:$0xff]  ;;  %v988_v10 = vld [vmem:[#allocation5 + $0xa8] sm:$0xff] }
  0x18   :  { %395 = vmatpush.bf16.msra.mxu3 %v998_v3  ;;  %v996_v11 = vld [vmem:[#allocation5 + $0xe8] sm:$0xff]  ;;  %v971_v12 = vld [vmem:[#allocation5 + $0x20] sm:$0xff]  ;;  %v970_v16 = vld [vmem:[#allocation5 + $0x18] sm:$0xff] }
  0x19   :  { %357 = vmatpush.bf16.msra.mxu0 %v973_v4  ;;  %v979_v13 = vld [vmem:[#allocation5 + $0x60] sm:$0xff]  ;;  %v978_v17 = vld [vmem:[#allocation5 + $0x58] sm:$0xff]  ;;  %v969_v20 = vld [vmem:[#allocation5 + $0x10] sm:$0xff] }
  0x1a   :  { %370 = vmatpush.bf16.msra.mxu1 %v981_v5  ;;  %v987_v14 = vld [vmem:[#allocation5 + $0xa0] sm:$0xff]  ;;  %v986_v18 = vld [vmem:[#allocation5 + $0x98] sm:$0xff]  ;;  %v977_v21 = vld [vmem:[#allocation5 + $0x50] sm:$0xff] }
  0x1b   :  { %383 = vmatpush.bf16.msra.mxu2 %v989_v6  ;;  %v995_v15 = vld [vmem:[#allocation5 + $0xe0] sm:$0xff]  ;;  %v994_v19 = vld [vmem:[#allocation5 + $0xd8] sm:$0xff]  ;;  %v985_v22 = vld [vmem:[#allocation5 + $0x90] sm:$0xff] }
  0x1c   :  { %396 = vmatpush.bf16.msra.mxu3 %v997_v7  ;;  %v993_v23 = vld [vmem:[#allocation5 + $0xd0] sm:$0xff]  ;;  %v968_v24 = vld [vmem:[#allocation5 + $0x8] sm:$0xff]  ;;  %v81_v29 = vld [vmem:[#allocation2 + $0x8] sm:$0xff] }
  0x1d   :  { %358 = vmatpush.bf16.msra.mxu0 %v972_v8  ;;  %v976_v25 = vld [vmem:[#allocation5 + $0x48] sm:$0xff]  ;;  %v80_v26 = vld [vmem:[#allocation2] sm:$0xff]  ;;  %v967_v32 = vld [vmem:[#allocation5] sm:$0xff]  ;;  %v154_v34 = vunpack.c.l.b16 %v81_v29  ;;  %v155_v35 = vunpack.c.h.b16 %v81_v29 }
  0x1e   :  { %371 = vmatpush.bf16.msra.mxu1 %v980_v9  ;;  %v984_v27 = vld [vmem:[#allocation5 + $0x88] sm:$0xff]  ;;  %v152_v30 = vunpack.c.l.b16 %v80_v26  ;;  %v153_v31 = vunpack.c.h.b16 %v80_v26  ;;  %v975_v33 = vld [vmem:[#allocation5 + $0x40] sm:$0xff]  ;;  %v1029_v43 = vld [vmem:[#allocation7 + $0xec] sm:$0xf0] }
  0x1f   :  { %384 = vmatpush.bf16.msra.mxu2 %v988_v10  ;;  %v992_v28 = vld [vmem:[#allocation5 + $0xc8] sm:$0xff]  ;;  %v983_v36 = vld [vmem:[#allocation5 + $0x80] sm:$0xff]  ;;  %v158_v40 = vpack.c.b16 %v154_v34, %v154_v34  ;;  %v159_v41 = vpack.c.b16 %v155_v35, %v155_v35  ;;  %v955_v46 = vld [vmem:[#allocation7 + $0xf0] sm:$0xf0] }
  0x20   :  { %397 = vmatpush.bf16.msra.mxu3 %v996_v11  ;;  %v991_v37 = vld [vmem:[#allocation5 + $0xc0] sm:$0xff]  ;;  %v156_v38 = vpack.c.b16 %v152_v30, %v152_v30  ;;  %v157_v39 = vpack.c.b16 %v153_v31, %v153_v31  ;;  %v961_v47 = vld [vmem:[#allocation7 + $0xe8] sm:$0xf]  ;;  %v1030_v48 = vld [vmem:[#allocation7 + $0xf4] sm:$0xf0] }
  0x21   :  { %359 = vmatpush.bf16.msra.mxu0 %v971_v12  ;;  %v953_v42 = vld [vmem:[#allocation7 + $0xe0] sm:$0xf]  ;;  %v1027_v44 = vld [vmem:[#allocation7 + $0xe4] sm:$0xf]  ;;  %v962_v50 = vor.u32 %v1030_v48, %v961_v47  ;;  %v1028_v51 = vld [vmem:[#allocation7 + $0xec] sm:$0xf] }
  0x22   :  { %372 = vmatpush.bf16.msra.mxu1 %v979_v13  ;;  %v954_v45 = vor.u32 %v1029_v43, %v953_v42  ;;  %v958_v49 = vor.u32 %v1027_v44, %v955_v46  ;;  %v963_v52 = vld [vmem:[#allocation7 + $0xf8] sm:$0xf0]  ;;  %v937_v54 = vld [vmem:[#allocation7 + $0xc0] sm:$0xf]  ;;  %v1025_v55 = vld [vmem:[#allocation7 + $0xcc] sm:$0xf0] }
  0x23   :  { %385 = vmatpush.bf16.msra.mxu2 %v987_v14  ;;  %v966_v53 = vor.u32 %v1028_v51, %v963_v52  ;;  %v1023_v56 = vld [vmem:[#allocation7 + $0xc4] sm:$0xf]  ;;  %v938_v57 = vor.u32 %v1025_v55, %v937_v54  ;;  %v939_v58 = vld [vmem:[#allocation7 + $0xd0] sm:$0xf0]  ;;  %v945_v59 = vld [vmem:[#allocation7 + $0xc8] sm:$0xf] }
  0x24   :  { %398 = vmatpush.bf16.msra.mxu3 %v995_v15  ;;  %v1026_v60 = vld [vmem:[#allocation7 + $0xd4] sm:$0xf0]  ;;  %v942_v61 = vor.u32 %v1023_v56, %v939_v58  ;;  %v1024_v63 = vld [vmem:[#allocation7 + $0xcc] sm:$0xf]  ;;  %v947_v0 = vld [vmem:[#allocation7 + $0xd8] sm:$0xf0] }
  0x25   :  { %360 = vmatpush.bf16.msra.mxu0 %v970_v16  ;;  %v946_v62 = vor.u32 %v1026_v60, %v945_v59  ;;  %v950_v1 = vor.u32 %v1024_v63, %v947_v0  ;;  %v921_v2 = vld [vmem:[#allocation7 + $0xa0] sm:$0xf]  ;;  %v1021_v3 = vld [vmem:[#allocation7 + $0xac] sm:$0xf0]  ;;  %v1019_v4 = vld [vmem:[#allocation7 + $0xa4] sm:$0xf] }
  0x26   :  { %373 = vmatpush.bf16.msra.mxu1 %v978_v17  ;;  %v922_v5 = vor.u32 %v1021_v3, %v921_v2  ;;  %v923_v6 = vld [vmem:[#allocation7 + $0xb0] sm:$0xf0]  ;;  %v929_v7 = vld [vmem:[#allocation7 + $0xa8] sm:$0xf]  ;;  %v1022_v8 = vld [vmem:[#allocation7 + $0xb4] sm:$0xf0] }
  0x27   :  { %386 = vmatpush.bf16.msra.mxu2 %v986_v18  ;;  %v926_v9 = vor.u32 %v1019_v4, %v923_v6  ;;  %v930_v10 = vor.u32 %v1022_v8, %v929_v7  ;;  %v1020_v11 = vld [vmem:[#allocation7 + $0xac] sm:$0xf]  ;;  %v931_v12 = vld [vmem:[#allocation7 + $0xb8] sm:$0xf0]  ;;  %v905_v14 = vld [vmem:[#allocation7 + $0x80] sm:$0xf] }
  0x28   :  { %399 = vmatpush.bf16.msra.mxu3 %v994_v19  ;;  %v934_v13 = vor.u32 %v1020_v11, %v931_v12  ;;  %v1017_v15 = vld [vmem:[#allocation7 + $0x8c] sm:$0xf0]  ;;  %v1015_v16 = vld [vmem:[#allocation7 + $0x84] sm:$0xf]  ;;  %v907_v18 = vld [vmem:[#allocation7 + $0x90] sm:$0xf0] }
  0x29   :  { %361 = vmatpush.bf16.msra.mxu0 %v969_v20  ;;  %v906_v17 = vor.u32 %v1017_v15, %v905_v14  ;;  %v913_v19 = vld [vmem:[#allocation7 + $0x88] sm:$0xf]  ;;  %v1018_v20 = vld [vmem:[#allocation7 + $0x94] sm:$0xf0]  ;;  %v889_v26 = vld [vmem:[#allocation7 + $0x60] sm:$0xf] }
  0x2a   :  { %374 = vmatpush.bf16.msra.mxu1 %v977_v21  ;;  %v910_v21 = vor.u32 %v1015_v16, %v907_v18  ;;  %v891_v30 = vld [vmem:[#allocation7 + $0x70] sm:$0xf0]  ;;  %v897_v31 = vld [vmem:[#allocation7 + $0x68] sm:$0xf]  ;;  %v1012_v35 = vld [vmem:[#allocation7 + $0x6c] sm:$0xf] }
  0x2b   :  { %387 = vmatpush.bf16.msra.mxu2 %v985_v22  ;;  %v914_v22 = vor.u32 %v1018_v20, %v913_v19  ;;  %v875_v42 = vld [vmem:[#allocation7 + $0x50] sm:$0xf0]  ;;  %v881_v43 = vld [vmem:[#allocation7 + $0x48] sm:$0xf]  ;;  %v1010_v44 = vld [vmem:[#allocation7 + $0x54] sm:$0xf0] }
  0x2c   :  { %400 = vmatpush.bf16.msra.mxu3 %v993_v23  ;;  %v1016_v23 = vld [vmem:[#allocation7 + $0x8c] sm:$0xf]  ;;  %v882_v46 = vor.u32 %v1010_v44, %v881_v43  ;;  %v883_v48 = vld [vmem:[#allocation7 + $0x58] sm:$0xf0]  ;;  %v1005_v51 = vld [vmem:[#allocation7 + $0x2c] sm:$0xf0] }
  0x2d   :  { %362 = vmatpush.bf16.msra.mxu0 %v968_v24  ;;  %v915_v24 = vld [vmem:[#allocation7 + $0x98] sm:$0xf0]  ;;  %v1008_v47 = vld [vmem:[#allocation7 + $0x4c] sm:$0xf]  ;;  %v1003_v52 = vld [vmem:[#allocation7 + $0x24] sm:$0xf] }
  0x2e   :  { %375 = vmatpush.bf16.msra.mxu1 %v976_v25  ;;  %v918_v25 = vor.u32 %v1016_v23, %v915_v24  ;;  %v859_v54 = vld [vmem:[#allocation7 + $0x30] sm:$0xf0]  ;;  %v865_v55 = vld [vmem:[#allocation7 + $0x28] sm:$0xf]  ;;  %v1006_v56 = vld [vmem:[#allocation7 + $0x34] sm:$0xf0] }
  0x2f   :  { %388 = vmatpush.bf16.msra.mxu2 %v984_v27  ;;  %v1013_v27 = vld [vmem:[#allocation7 + $0x6c] sm:$0xf0]  ;;  %v866_v58 = vor.u32 %v1006_v56, %v865_v55  ;;  %v1004_v59 = vld [vmem:[#allocation7 + $0x2c] sm:$0xf]  ;;  %v867_v60 = vld [vmem:[#allocation7 + $0x38] sm:$0xf0] }
  0x30   :  { %401 = vmatpush.bf16.msra.mxu3 %v992_v28  ;;  %v1011_v28 = vld [vmem:[#allocation7 + $0x64] sm:$0xf]  ;;  %v890_v29 = vor.u32 %v1013_v27, %v889_v26  ;;  %v841_v63 = vld [vmem:[#allocation7] sm:$0xf]  ;;  %v1001_v0 = vld [vmem:[#allocation7 + $0xc] sm:$0xf0] }
  0x31   :  { %363 = vmatpush.bf16.msra.mxu0 %v967_v32  ;;  %v1014_v32 = vld [vmem:[#allocation7 + $0x74] sm:$0xf0]  ;;  %v842_v2 = vor.u32 %v1001_v0, %v841_v63  ;;  %v843_v3 = vld [vmem:[#allocation7 + $0x10] sm:$0xf0]  ;;  %v849_v4 = vld [vmem:[#allocation7 + $0x8] sm:$0xf] }
  0x32   :  { %376 = vmatpush.bf16.msra.mxu1 %v975_v33  ;;  %v894_v33 = vor.u32 %v1011_v28, %v891_v30  ;;  %v898_v34 = vor.u32 %v1014_v32, %v897_v31  ;;  %v1000_v8 = vld [vmem:[#allocation7 + $0xc] sm:$0xf] }
  0x33   :  { %389 = vmatpush.bf16.msra.mxu2 %v983_v36  ;;  %v899_v36 = vld [vmem:[#allocation7 + $0x78] sm:$0xf0] }
  0x34   :  { %402 = vmatpush.bf16.msra.mxu3 %v991_v37  ;;  %364 = vmatmul.bf16.vlgmr.msra.gmra.mxu0 %v156_v38  ;;  %v902_v37 = vor.u32 %v1012_v35, %v899_v36  ;;  %v873_v38 = vld [vmem:[#allocation7 + $0x40] sm:$0xf] }
  0x35   :  { %377 = vmatmul.bf16.vlgmr.msra.gmra.mxu1 %v157_v39  ;;  %616 = vmatpush.bf16.msrb.mxu0 %v954_v45  ;;  %v1009_v39 = vld [vmem:[#allocation7 + $0x4c] sm:$0xf0] }
  0x36   :  { %390 = vmatmul.bf16.vlgmr.msra.gmra.mxu2 %v158_v40  ;;  %629 = vmatpush.bf16.msrb.mxu1 %v958_v49  ;;  %v1007_v40 = vld [vmem:[#allocation7 + $0x44] sm:$0xf]  ;;  %v886_v49 = vor.u32 %v1008_v47, %v883_v48 }
  0x37   :  { %403 = vmatmul.bf16.vlgmr.msra.gmra.mxu3 %v159_v41  ;;  %642 = vmatpush.bf16.msrb.mxu2 %v962_v50  ;;  %v874_v41 = vor.u32 %v1009_v39, %v873_v38  ;;  %v878_v45 = vor.u32 %v1007_v40, %v875_v42  ;;  %v857_v50 = vld [vmem:[#allocation7 + $0x20] sm:$0xf] }
  0x38   :  { %655 = vmatpush.bf16.msrb.mxu3 %v966_v53  ;;  %v858_v53 = vor.u32 %v1005_v51, %v857_v50 }
  0x39   :  { %617 = vmatpush.bf16.msrb.mxu0 %v938_v57  ;;  %v862_v57 = vor.u32 %v1003_v52, %v859_v54 }
  0x3a   :  { %630 = vmatpush.bf16.msrb.mxu1 %v942_v61  ;;  %v1040_v61 = vld [vmem:[%s1248_s2] ss:$0 sm:$0xff]  ;;  %s1197_s2 = smov [#allocation10]  }
  0x3b   :  { %643 = vmatpush.bf16.msrb.mxu2 %v946_v62  ;;  %v870_v62 = vor.u32 %v1004_v59, %v867_v60  ;;  %s697_s15 = sshll.u32 %s1197_s2, 4  ;;  %s698_s15 = int_to_ptr.vmem [resolvable:$true] %s697_s15 }
  0x3c   :  { %656 = vmatpush.bf16.msrb.mxu3 %v950_v1  ;;  %v999_v1 = vld [vmem:[#allocation7 + $0x4] sm:$0xf] }
  0x3d   :  { %618 = vmatpush.bf16.msrb.mxu0 %v922_v5  ;;  %v1002_v5 = vld [vmem:[#allocation7 + $0x14] sm:$0xf0]  ;;  %v846_v6 = vor.u32 %v999_v1, %v843_v3 }
  0x3e   :  { %631 = vmatpush.bf16.msrb.mxu1 %v926_v9  ;;  %v850_v7 = vor.u32 %v1002_v5, %v849_v4  ;;  %v851_v9 = vld [vmem:[#allocation7 + $0x18] sm:$0xf0] }
  0x3f   :  { %644 = vmatpush.bf16.msrb.mxu2 %v930_v10  ;;  %v854_v10 = vor.u32 %v1000_v8, %v851_v9 }
  0x40   :  { %657 = vmatpush.bf16.msrb.mxu3 %v934_v13 }
  0x41   :  { %619 = vmatpush.bf16.msrb.mxu0 %v906_v17 }
  0x42   :  { %632 = vmatpush.bf16.msrb.mxu1 %v910_v21 }
  0x43   :  { %645 = vmatpush.bf16.msrb.mxu2 %v914_v22 }
  0x44   :  { %658 = vmatpush.bf16.msrb.mxu3 %v918_v25 }
  0x45   :  { %620 = vmatpush.bf16.msrb.mxu0 %v890_v29  ;;  %v446_v29 = vld [vmem:[#allocation8] sm:$0xf] }
  0x46   :  { %633 = vmatpush.bf16.msrb.mxu1 %v894_v33  ;;  %v448_v30 = vperm.slane %v446_v29, 0  ;;  %v449_v31 = vperm.slane %v446_v29, 1  ;;  %v450_v38 = vperm.slane %v446_v29, 2  ;;  %v451_v39 = vperm.slane %v446_v29, 3 }
  0x47   :  { %646 = vmatpush.bf16.msrb.mxu2 %v898_v34 }
  0x48   :  { %659 = vmatpush.bf16.msrb.mxu3 %v902_v37 }
  0x49   :  { %621 = vmatpush.bf16.msrb.mxu0 %v874_v41 }
  0x4a   :  { %634 = vmatpush.bf16.msrb.mxu1 %v878_v45 }
  0x4b   :  { %647 = vmatpush.bf16.msrb.mxu2 %v882_v46 }
  0x4c   :  { %660 = vmatpush.bf16.msrb.mxu3 %v886_v49 }
  0x4d   :  { %622 = vmatpush.bf16.msrb.mxu0 %v858_v53 }
  0x4e   :  { %635 = vmatpush.bf16.msrb.mxu1 %v862_v57 }
  0x4f   :  { %648 = vmatpush.bf16.msrb.mxu2 %v866_v58 }
  0x50   :  { %661 = vmatpush.bf16.msrb.mxu3 %v870_v62 }
  0x51   :  { %623 = vmatpush.bf16.msrb.mxu0 %v842_v2 }
  0x52   :  { %636 = vmatpush.bf16.msrb.mxu1 %v846_v6 }
  0x53   :  { %649 = vmatpush.bf16.msrb.mxu2 %v850_v7 }
  0x54   :  { %662 = vmatpush.bf16.msrb.mxu3 %v854_v10 }
  0xb1   :  { %v365_v11 = vpop.f32.mrf.mxu0 }
  0xb2   :  { %v378_v12 = vpop.f32.mrf.mxu1  ;;  %v366_v13 = vadd.f32 %v1040_v61, %v365_v11 }
  0xb4   :  { %v379_v14 = vadd.f32 %v378_v12, %v366_v13 }
  0xb9   :  { %v391_v15 = vpop.f32.mrf.mxu2  ;;  %v367_v18 = vpop.f32.mrf.mxu0 }
  0xba   :  { %v404_v16 = vpop.f32.mrf.mxu3  ;;  %v392_v17 = vadd.f32 %v391_v15, %v379_v14  ;;  %v380_v19 = vpop.f32.mrf.mxu1 }
  0xbc   :  { %v405_v20 = vadd.f32 %v404_v16, %v392_v17 }
  0xbe   :  { %v408_v21 = vsub.f32 0.0, %v405_v20 }
  0xc0   :  { %v409_v22 = vmul.f32 1.442695, %v408_v21 }
  0xc1   :  { %v393_v23 = vpop.f32.mrf.mxu2 }
  0xc2   :  { %v406_v24 = vpop.f32.mrf.mxu3  ;;  %1041 = vpow2.f32 %v409_v22 }
  0xc8   :  { %v1042_v25 = vpop.eup %1041 }
  0xc9   :  { %v411_v26 = vadd.f32 1.0, %v1042_v25 }
  0xcb   :  { %1043 = vrcp.f32 %v411_v26 }
  0xd1   :  { %v1044_v27 = vpop.eup %1043 }
  0xd2   :  { %v413_v28 = vpack.c.bf16 %v1044_v27, %v1044_v27 }
  0xd4   :  { %624 = vmatmul.bf16.vlgmr.msrb.gmra.mxu0 %v413_v28  ;;  %637 = vmatmul.bf16.vlgmr.msrb.gmra.mxu1 %v413_v28 }
  0xd5   :  { %650 = vmatmul.bf16.vlgmr.msrb.gmra.mxu2 %v413_v28  ;;  %663 = vmatmul.bf16.vlgmr.msrb.gmra.mxu3 %v413_v28 }
 0x151   :  { %v625_v32 = vpop.f32.mrf.mxu0  ;;  %v638_v33 = vpop.f32.mrf.mxu1 }
 0x152   :  { %v626_v34 = vadd.f32 %v625_v32, %v448_v30  ;;  %v639_v35 = vadd.f32 %v638_v33, %v449_v31 }
 0x154   :  { %v668_v36 = vsub.f32 0.0, %v626_v34  ;;  %v669_v37 = vsub.f32 0.0, %v639_v35 }
 0x156   :  { %v672_v40 = vmul.f32 1.442695, %v668_v36  ;;  %v674_v41 = vmul.f32 1.442695, %v669_v37 }
 0x158   :  { %1045 = vpow2.f32 %v672_v40  ;;  %v651_v42 = vpop.f32.mrf.mxu2  ;;  %v664_v43 = vpop.f32.mrf.mxu3 }
 0x159   :  { %1047 = vpow2.f32 %v674_v41  ;;  %v652_v44 = vadd.f32 %v651_v42, %v450_v38  ;;  %v665_v45 = vadd.f32 %v664_v43, %v451_v39  ;;  %v627_v46 = vpop.f32.mrf.mxu0  ;;  %v640_v47 = vpop.f32.mrf.mxu1 }
 0x15b   :  { %v670_v48 = vsub.f32 0.0, %v652_v44  ;;  %v671_v49 = vsub.f32 0.0, %v665_v45 }
 0x15d   :  { %v676_v50 = vmul.f32 1.442695, %v670_v48  ;;  %v678_v51 = vmul.f32 1.442695, %v671_v49 }
 0x15e   :  { %v1046_v52 = vpop.eup %1045 }
 0x15f   :  { %v1048_v53 = vpop.eup %1047  ;;  %v680_v54 = vadd.f32 1.0, %v1046_v52  ;;  %1049 = vpow2.f32 %v676_v50 }
 0x160   :  { %v681_v55 = vadd.f32 1.0, %v1048_v53  ;;  %1051 = vpow2.f32 %v678_v51  ;;  %v653_v56 = vpop.f32.mrf.mxu2  ;;  %v666_v57 = vpop.f32.mrf.mxu3 }
 0x161   :  { %1053 = vrcp.f32 %v680_v54 }
 0x162   :  { %1055 = vrcp.f32 %v681_v55 }
 0x165   :  { %v1050_v58 = vpop.eup %1049 }
 0x166   :  { %v1052_v59 = vpop.eup %1051  ;;  %v682_v60 = vadd.f32 1.0, %v1050_v58 }
 0x167   :  { %v1054_v61 = vpop.eup %1053  ;;  %v683_v62 = vadd.f32 1.0, %v1052_v59 }
 0x168   :  { %v1056_v63 = vpop.eup %1055  ;;  %688 = vst [vmem:[#allocation10] sm:$0xff] %v1054_v61  ;;  %1057 = vrcp.f32 %v682_v60 }
 0x169   :  { %689 = vst [vmem:[#allocation10 + $0x8] sm:$0xff] %v1056_v63  ;;  %1059 = vrcp.f32 %v683_v62 }
 0x16e   :  { %v1058_v0 = vpop.eup %1057 }
 0x16f   :  { %v1060_v1 = vpop.eup %1059  ;;  %690 = vst [vmem:[#allocation10 + $0x10] sm:$0xff] %v1058_v0 }
 0x170   :  { %691 = vst [vmem:[#allocation10 + $0x18] sm:$0xff] %v1060_v1 }
 0x171   :  { %702 = dma.vmem_to_hbm [thread:$0]  %s698_s15, 512, %s700_s18, [#allocation4]  }
 0x172   :  { %1187 = dma.done.wait [#allocation4], 512  }
 0x173   :  { %1188 = vsyncadd [#allocation4], 4294966784 }
 0x174   :  { %707 = vsyncpa [#allocation3], 1 }
 0x175   :  { %708 = vsyncpa [#allocation6], 1 }
 0x176   :  { %709 = vsyncpa [#allocation9], 1 }
 0x177   :  { %710 = vsyncpa [#allocation4], 1 }

</bundles_post_ra>
